<compile_context>
chip_gen: v7x
topology: tpu7x:2x2x1
jax: 0.10.0
libtpu: 0.0.40
codegen_flags: <defaults>
</compile_context>

<pallas_src>
import math

import jax
import jax.numpy as jnp
from jax.experimental import pallas as pl
from jax.experimental.pallas import tpu as pltpu


# ----------------------------------------------------------------------------
# Kernels (operate on lane-dense, (batch*channel)-row flattened views)
# ----------------------------------------------------------------------------
def _pe_add_kernel(patch_ref, pe_ref, out_ref):
    # patch_ref: (T, P*D)   pe_ref: (1, P*D)   out_ref: (T, P*D)
    out_ref[...] = (patch_ref[...] + pe_ref[...]).astype(out_ref.dtype)


def _pe_add_cls_lane_kernel(patch_ref, pe_ref, out_ref):
    # Lane-splice layout (requires d_model % 128 == 0 for aligned stores).
    # patch_ref: (T, P*D)
    # pe_ref:    (1, (P+1)*D)  = [cls_token + pe[0] | pe[1:]]  (grid-resident)
    # out_ref:   (T, (P+1)*D)  two wide, lane-aligned stores (no concat/vreg slab)
    t = out_ref.shape[0]
    d = out_ref.shape[1] - patch_ref.shape[1]       # = d_model
    out_ref[:, :d] = jnp.broadcast_to(pe_ref[:, :d], (t, d)).astype(out_ref.dtype)
    out_ref[:, d:] = (patch_ref[...] + pe_ref[:, d:]).astype(out_ref.dtype)


def _pe_add_cls_patch_kernel(patch_ref, pe_ref, out_ref):
    # 3-D fallback layout (d_model % 128 != 0): splice along the patch axis so
    # every store stays (sublane, lane)-tile aligned instead of lane-spliced.
    # patch_ref: (T, P, D)   pe_ref: (1, P+1, D)   out_ref: (T, P+1, D)
    t, _, d = out_ref.shape
    out_ref[:, :1, :] = jnp.broadcast_to(pe_ref[:, :1, :], (t, 1, d)).astype(out_ref.dtype)
    out_ref[:, 1:, :] = (patch_ref[...] + pe_ref[:, 1:, :]).astype(out_ref.dtype)


# ----------------------------------------------------------------------------
# Tiling / VMEM heuristics
# ----------------------------------------------------------------------------
_SUBLANE_MULT = {1: 32, 2: 16, 4: 8, 8: 8}   # dtype itemsize -> native sublane packing


def _block_budget_bytes():
    """Target bytes per output block: ~4-8 MiB, generation-aware.

    2x double-buffered (in + out) blocks must stay well under physical VMEM
    (64 MiB on v7x, 128 MiB on v5e/v6e)."""
    try:
        vmem = pltpu.get_tpu_info().vmem_capacity_bytes
    except Exception:
        vmem = 64 << 20                      # conservative: v7x per-TC VMEM
    return int(min(8 << 20, max(2 << 20, vmem // 12)))


def _choose_tile_rows(bc, out_row_bytes, itemsize, budget_bytes,
                      min_split_bytes=512 * 1024):
    """Rows per grid step.

    * Rounded to the dtype's native sublane packing (8 f32 / 16 bf16 / 32 i8)
      so stores stay unmasked and vregs full.
    * Block kept under `budget_bytes` (big DMAs, low per-step overhead).
    * Once total data exceeds ~512 KiB, the grid is forced to >= 2 steps so
      the "parallel" row axis can shard across both v7x TensorCores and the
      pipeline actually overlaps DMA with compute/writeback.
    """
    m = _SUBLANE_MULT.get(itemsize, 8)
    total = bc * out_row_bytes
    if bc <= m or total <= min_split_bytes:
        return bc                            # single full block (always legal)
    # Largest tile whose output block fits the budget.
    tile_budget = max(m, (budget_bytes // max(out_row_bytes, 1)) // m * m)
    # Cap so the grid has >= 2 steps (ceil(bc/2) rounded up to m still -> 2 steps).
    half = -(-bc // 2)
    tile_half = -(-half // m) * m
    return max(m, min(tile_budget, tile_half))


def _vmem_limit_bytes(tile, in_row_bytes, out_row_bytes, pe_bytes):
    # Double-buffered in + out tiles, grid-resident PE row(s), plus slack.
    need = 2 * tile * (in_row_bytes + out_row_bytes) + 2 * pe_bytes + (4 << 20)
    return int(min(max(need, 32 << 20), 48 << 20))


# ----------------------------------------------------------------------------
# Wrapper
# ----------------------------------------------------------------------------
def patchtst_positional_encoding(patch_input, position_enc, cls_token=None,
                                 use_cls_token=False, tile_rows=None,
                                 force_pallas=False, donate_input=False,
                                 min_pallas_bytes=4 << 20):
    """Pallas implementation of PatchTSTPositionalEncoding.forward (eval mode).

    positional_dropout == 0 -> nn.Identity().
    donate_input=True adds input_output_aliases={0:0} on the no-cls path; it is
    only safe when the caller actually donates patch_input (never reads it again).
    """
    b, c, p, d = patch_input.shape
    dtype = patch_input.dtype
    bc = b * c
    itemsize = jnp.dtype(dtype).itemsize

    # Tiny inputs: Pallas launch/pipeline overhead dominates; XLA's fused
    # broadcast-add already hits roofline for this trivial op.
    total_bytes = bc * (p + (1 if use_cls_token else 0)) * d * itemsize * 2
    if not force_pallas and total_bytes < min_pallas_bytes:
        return reference_forward(patch_input, position_enc, cls_token, use_cls_token)

    budget = _block_budget_bytes()

    # Lane-dense flattened view (contiguous -> free reshape).
    patch2d = patch_input.reshape(bc, p * d)

    if not use_cls_token:
        assert position_enc.shape == (p, d)
        pe2d = position_enc.astype(dtype).reshape(1, p * d)
        row_bytes = p * d * itemsize
        tile = tile_rows if tile_rows is not None else _choose_tile_rows(
            bc, row_bytes, itemsize, budget)
        out2d = pl.pallas_call(
            _pe_add_kernel,
            out_shape=jax.ShapeDtypeStruct((bc, p * d), dtype),
            grid_spec=pltpu.PrefetchScalarGridSpec(
                num_scalar_prefetch=0,
                grid=(pl.cdiv(bc, tile),),
                in_specs=[
                    pl.BlockSpec((tile, p * d), lambda i: (i, 0)),
                    pl.BlockSpec((1, p * d), lambda i: (0, 0)),
                ],
                out_specs=pl.BlockSpec((tile, p * d), lambda i: (i, 0)),
            ),
            compiler_params=pltpu.CompilerParams(
                dimension_semantics=("parallel",),
                vmem_limit_bytes=_vmem_limit_bytes(tile, row_bytes, row_bytes,
                                                   p * d * itemsize)),
            cost_estimate=pl.CostEstimate(
                flops=bc * p * d,
                transcendentals=0,
                bytes_accessed=(2 * bc * p * d + p * d) * itemsize),
            input_output_aliases=({0: 0} if donate_input else {}),
        )(patch2d, pe2d)
        return out2d.reshape(b, c, p, d)

    # ---- use_cls_token path --------------------------------------------------
    assert position_enc.shape == (p + 1, d)
    assert cls_token is not None and cls_token.shape == (1, 1, 1, d)

    # Batch/channel invariant -> fold cls_token + position_enc[0] once and fuse
    # the whole PE into a single grid-resident operand (one DMA, one argument).
    pe_full = jnp.concatenate(
        [cls_token.reshape(1, d) + position_enc[:1, :], position_enc[1:, :]],
        axis=0).astype(dtype)                                         # (P+1, D)

    in_row_bytes = p * d * itemsize
    out_row_bytes = (p + 1) * d * itemsize
    pe_bytes = (p + 1) * d * itemsize
    tile = tile_rows if tile_rows is not None else _choose_tile_rows(
        bc, out_row_bytes, itemsize, budget)
    vmem_limit = _vmem_limit_bytes(tile, in_row_bytes, out_row_bytes, pe_bytes)
    cost = pl.CostEstimate(
        flops=bc * p * d,
        transcendentals=0,
        bytes_accessed=(bc * p * d + bc * (p + 1) * d + (p + 1) * d) * itemsize)
    cparams = pltpu.CompilerParams(
        dimension_semantics=("parallel",), vmem_limit_bytes=vmem_limit)

    if d % 128 == 0:
        # Primary path: lane-dense 2-D splice, two wide aligned stores.
        out2d = pl.pallas_call(
            _pe_add_cls_lane_kernel,
            out_shape=jax.ShapeDtypeStruct((bc, (p + 1) * d), dtype),
            grid_spec=pltpu.PrefetchScalarGridSpec(
                num_scalar_prefetch=0,
                grid=(pl.cdiv(bc, tile),),
                in_specs=[
                    pl.BlockSpec((tile, p * d), lambda i: (i, 0)),
                    pl.BlockSpec((1, (p + 1) * d), lambda i: (0, 0)),
                ],
                out_specs=pl.BlockSpec((tile, (p + 1) * d), lambda i: (i, 0)),
            ),
            compiler_params=cparams,
            cost_estimate=cost,
        )(patch2d, pe_full.reshape(1, (p + 1) * d))
        return out2d.reshape(b, c, p + 1, d)

    # Fallback path (d_model not lane-aligned): 3-D blocks, splice on patch axis.
    patch3d = patch_input.reshape(bc, p, d)
    out3d = pl.pallas_call(
        _pe_add_cls_patch_kernel,
        out_shape=jax.ShapeDtypeStruct((bc, p + 1, d), dtype),
        grid_spec=pltpu.PrefetchScalarGridSpec(
            num_scalar_prefetch=0,
            grid=(pl.cdiv(bc, tile),),
            in_specs=[
                pl.BlockSpec((tile, p, d), lambda i: (i, 0, 0)),
                pl.BlockSpec((1, p + 1, d), lambda i: (0, 0, 0)),
            ],
            out_specs=pl.BlockSpec((tile, p + 1, d), lambda i: (i, 0, 0)),
        ),
        compiler_params=cparams,
        cost_estimate=cost,
    )(patch3d, pe_full.reshape(1, p + 1, d))
    return out3d.reshape(b, c, p + 1, d)


# ----------------------------------------------------------------------------
# Deterministic parameter init (mirrors PatchTSTPositionalEncoding.__init__)
# ----------------------------------------------------------------------------
def init_sincos_position_enc(num_patches, d_model, dtype=jnp.float32):
    """'sincos' branch of _init_pe (deterministic)."""
    position = jnp.arange(0, num_patches, dtype=jnp.float32)[:, None]        # (P, 1)
    div_term = jnp.exp(jnp.arange(0, d_model, 2, dtype=jnp.float32)
                       * -(math.log(10000.0) / d_model))                      # (D/2,)
    pe = jnp.zeros((num_patches, d_model), dtype=jnp.float32)
    pe = pe.at[:, 0::2].set(jnp.sin(position * div_term))
    pe = pe.at[:, 1::2].set(jnp.cos(position * div_term))
    pe = pe - pe.mean()
    pe = pe / (pe.std(ddof=1) * 10.0)  # torch.std is unbiased by default
    return pe.astype(dtype)


# ----------------------------------------------------------------------------
# Pure-JAX reference (also used as the tiny-input XLA fallback)
# ----------------------------------------------------------------------------
def reference_forward(patch_input, position_enc, cls_token, use_cls_token):
    if use_cls_token:
        b, c, _, d = patch_input.shape
        patched = patch_input + position_enc[1:, :]
        cls_tok = cls_token + position_enc[:1, :]               # (1, 1, 1, D)
        cls_tokens = jnp.broadcast_to(cls_tok, (b, c, 1, d))
        return jnp.concatenate((cls_tokens, patched), axis=2)
    return patch_input + position_enc


# ----------------------------------------------------------------------------
if __name__ == "__main__":
    # Small PatchTST-like shapes; d_model=128 keeps the lane layout dense.
    batch, num_channels, num_patches, d_model = 2, 8, 8, 128

    key = jax.random.PRNGKey(0)
    patch_input = jax.random.normal(
        key, (batch, num_channels, num_patches, d_model), dtype=jnp.float32)
    cls_token = jnp.zeros((1, 1, 1, d_model), dtype=jnp.float32)

    # --- use_cls_token = True (lane-aligned primary path) ---------------------
    pe_cls = init_sincos_position_enc(num_patches + 1, d_model)
    ref = reference_forward(patch_input, pe_cls, cls_token, True)

    out = patchtst_positional_encoding(
        patch_input, pe_cls, cls_token, use_cls_token=True, force_pallas=True)
    out = jax.block_until_ready(out)
    assert out.shape == (batch, num_channels, num_patches + 1, d_model), out.shape
    assert jnp.allclose(out, ref, atol=1e-6), "mismatch vs reference (cls)"

    # Multi-block grid path (2 grid steps over batch*channels rows).
    out_mb = patchtst_positional_encoding(
        patch_input, pe_cls, cls_token, use_cls_token=True,
        tile_rows=8, force_pallas=True)
    out_mb = jax.block_until_ready(out_mb)
    assert jnp.allclose(out_mb, ref, atol=1e-6), "mismatch vs reference (cls, tiled)"

    # --- use_cls_token = True with non-lane-aligned d_model (3-D fallback) ----
    d_small = 64
    patch_small = jax.random.normal(
        jax.random.PRNGKey(1), (batch, num_channels, num_patches, d_small),
        dtype=jnp.float32)
    cls_small = jnp.zeros((1, 1, 1, d_small), dtype=jnp.float32)
    pe_small = init_sincos_position_enc(num_patches + 1, d_small)
    ref_small = reference_forward(patch_small, pe_small, cls_small, True)
    out_small = patchtst_positional_encoding(
        patch_small, pe_small, cls_small, use_cls_token=True, force_pallas=True)
    out_small = jax.block_until_ready(out_small)
    assert jnp.allclose(out_small, ref_small, atol=1e-6), "mismatch (cls, 3-D path)"

    # --- use_cls_token = False -------------------------------------------------
    pe = init_sincos_position_enc(num_patches, d_model)
    ref2 = reference_forward(patch_input, pe, None, False)

    out2 = patchtst_positional_encoding(
        patch_input, pe, use_cls_token=False, force_pallas=True)
    out2 = jax.block_until_ready(out2)
    assert jnp.allclose(out2, ref2, atol=1e-6), "mismatch vs reference (no cls)"

    out2_mb = patchtst_positional_encoding(
        patch_input, pe, use_cls_token=False, tile_rows=8, force_pallas=True)
    out2_mb = jax.block_until_ready(out2_mb)
    assert jnp.allclose(out2_mb, ref2, atol=1e-6), "mismatch vs reference (no cls, tiled)"

    # --- tiny-input auto fallback (plain XLA path) ------------------------------
    out_fb = patchtst_positional_encoding(patch_input, pe, use_cls_token=False)
    out_fb = jax.block_until_ready(out_fb)
    assert jnp.allclose(out_fb, ref2, atol=1e-6), "mismatch vs reference (xla fallback)"

    print("KERNEL_OK")
</pallas_src>

<mosaic_0001>
module attributes {stable_mosaic.version = 11 : i64} {
  func.func @_pe_add_cls_lane_kernel(%arg0: i32, %arg1: memref<16x1024xf32, #tpu.memory_space<vmem>>, %arg2: memref<1x1152xf32, #tpu.memory_space<vmem>>, %arg3: memref<16x1152xf32, #tpu.memory_space<vmem>>) attributes {dimension_semantics = [#tpu.dimension_semantics<parallel>], iteration_bounds = array<i64: 1>, scalar_prefetch = 0 : i64, scratch_operands = 0 : i64, tpu.core_type = #tpu.core_type<tc>, window_params = [{transform_indices = @transform_0, window_bounds = array<i64: 16, 1024>}, {pipeline_mode = #tpu.pipeline_mode<synchronous>, transform_indices = @transform_1, window_bounds = array<i64: 1, 1152>}, {transform_indices = @transform_2, window_bounds = array<i64: 16, 1152>}]} {
    %c0 = arith.constant 0 : index
    %c0_0 = arith.constant 0 : index
    %0 = vector.load %arg2[%c0, %c0_0] : memref<1x1152xf32, #tpu.memory_space<vmem>>, vector<1x128xf32>
    %1 = vector.shape_cast %0 : vector<1x128xf32> to vector<1x128xf32>
    %2 = vector.broadcast %1 : vector<1x128xf32> to vector<16x128xf32>
    %c0_1 = arith.constant 0 : index
    %c0_2 = arith.constant 0 : index
    %3 = vector.load %arg3[%c0_1, %c0_2] : memref<16x1152xf32, #tpu.memory_space<vmem>>, vector<16x128xf32>
    tpu.vector_store %arg3[%c0_1, %c0_2], %2 {strides = array<i32>} : memref<16x1152xf32, #tpu.memory_space<vmem>>, vector<16x128xf32>,
    %c0_3 = arith.constant 0 : index
    %c0_4 = arith.constant 0 : index
    %4 = vector.load %arg1[%c0_3, %c0_4] : memref<16x1024xf32, #tpu.memory_space<vmem>>, vector<16x1024xf32>
    %c0_5 = arith.constant 0 : index
    %c128 = arith.constant 128 : index
    %5 = vector.load %arg2[%c0_5, %c128] : memref<1x1152xf32, #tpu.memory_space<vmem>>, vector<1x1024xf32>
    %6 = vector.broadcast %5 : vector<1x1024xf32> to vector<16x1024xf32>
    %7 = arith.addf %4, %6 : vector<16x1024xf32>
    %c0_6 = arith.constant 0 : index
    %c128_7 = arith.constant 128 : index
    %8 = vector.load %arg3[%c0_6, %c128_7] : memref<16x1152xf32, #tpu.memory_space<vmem>>, vector<16x1024xf32>
    tpu.vector_store %arg3[%c0_6, %c128_7], %7 {strides = array<i32>} : memref<16x1152xf32, #tpu.memory_space<vmem>>, vector<16x1024xf32>,
    return
  }
  func.func @transform_0(%arg0: i32) -> (i32, i32) {
    %c0_i32 = arith.constant 0 : i32
    %c0_i32_0 = arith.constant 0 : i32
    return %arg0, %c0_i32 : i32, i32
  }
  func.func @transform_1(%arg0: i32) -> (i32, i32) {
    %c0_i32 = arith.constant 0 : i32
    %c0_i32_0 = arith.constant 0 : i32
    %c0_i32_1 = arith.constant 0 : i32
    return %c0_i32, %c0_i32_0 : i32, i32
  }
  func.func @transform_2(%arg0: i32) -> (i32, i32) {
    %c0_i32 = arith.constant 0 : i32
    %c0_i32_0 = arith.constant 0 : i32
    return %arg0, %c0_i32 : i32, i32
  }
}

</mosaic_0001>

<bundles_post_ra>
// kernel: tpu_custom_call.1
= control target key start
LH: loop header
LB: loop body
LE: loop exit
PB: predicated region body
PF: predicated region fallthrough
CT: control target
= control target key end

     0   :  { %7 = vsyncpa [#allocation3], 0  ;;  %s293_s0 = inlined_call_operand.hbm [shape: f32[16,1024], index: 0, kind: input, shape index: {}]   ;;  %s294_s1 = inlined_call_operand.hbm [shape: f32[1,1152], index: 1, kind: input, shape index: {}]   ;;  %s295_s2 = inlined_call_operand.hbm [shape: f32[16,1152], index: 2, kind: output, shape index: {}]  }
   0x1   :  { %8 = vsyncpa [#allocation6], 0 }
   0x2   :  { %9 = vsyncpa [#allocation4], 0  ;;  %s235_s9 = smov [#allocation2]   ;;  %s163_s13 = scalar_lea.hbm %s293_s0, 2048 }
   0x3   :  { %s15_s10 = sshll.u32 %s235_s9, 4  ;;  %p164_p0 = scmp.ne.s32.totalorder %s293_s0, %s163_s13  ;;  %s16_s10 = int_to_ptr.vmem [resolvable:$true] %s15_s10 }
   0x4   :  { %p167_p1 = scmp.lt.u32.totalorder %s163_s13, %s293_s0 }
   0x6   :  { %p169_p2 = pnand %p167_p1, %p164_p0 }
   0x8   :  { %172 = shalt.err (!%p169_p2)
}
   0x9   :  { %s173_s18 = scalar_lea.vmem %s16_s10, 2048  ;;  %p178_p4 = scmp.lt.s32.totalorder %s16_s10, %s16_s10 }
   0xa   :  { %p174_p3 = scmp.ne.s32.totalorder %s16_s10, %s173_s18  ;;  %p179_p5 = scmp.lt.s32.totalorder %s173_s18, %s173_s18 }
   0xc   :  { %p180_p6 = por %p179_p5, %p178_p4 }
   0xe   :  { %p181_p7 = pnand %p180_p6, %p174_p3 }
  0x10   :  { %184 = shalt.err (!%p181_p7)
}
  0x11   :  { %s236_s19 = smov 1024   ;;  %s237_s20 = smov 64  }
  0x12   :  { %21 = dma.hbm_to_vmem [thread:$0]  %s293_s0, 2048, %s16_s10, [#allocation3], %s236_s19, %s236_s19, %s237_s20  }
  0x13   :  { %s238_s23 = smov [#allocation5]   ;;  %s185_s27 = scalar_lea.hbm %s294_s1, 144 }
  0x14   :  { %s28_s24 = sshll.u32 %s238_s23, 4  ;;  %p186_p8 = scmp.ne.s32.totalorder %s294_s1, %s185_s27  ;;  %s29_s24 = int_to_ptr.vmem [resolvable:$true] %s28_s24 }
  0x15   :  { %p189_p9 = scmp.lt.u32.totalorder %s185_s27, %s294_s1 }
  0x17   :  { %p191_p10 = pnand %p189_p9, %p186_p8 }
  0x19   :  { %194 = shalt.err (!%p191_p10)
}
  0x1a   :  { %s195_s4 = scalar_lea.vmem %s29_s24, 144  ;;  %s199_s0 = scalar_lea.vmem %s29_s24, 160 }
  0x1b   :  { %p196_p11 = scmp.ne.s32.totalorder %s29_s24, %s195_s4  ;;  %p200_p12 = scmp.lt.s32.totalorder %s29_s24, %s29_s24 }
  0x1c   :  { %p201_p13 = scmp.lt.s32.totalorder %s199_s0, %s195_s4 }
  0x1e   :  { %p202_p0 = por %p201_p13, %p200_p12 }
  0x20   :  { %p203_p1 = pnand %p202_p0, %p196_p11 }
  0x22   :  { %206 = shalt.err (!%p203_p1)
}
  0x23   :  { %31 = dma.hbm_to_vmem [thread:$0]  %s294_s1, 144, %s29_s24, [#allocation6]  }
  0x24   :  { %229 = dma.done.wait [#allocation3], 2048  }
  0x25   :  { %230 = vsyncadd [#allocation3], 4294965248 }
  0x26   :  { %231 = dma.done.wait [#allocation6], 144  }
  0x27   :  { %232 = vsyncadd [#allocation6], 4294967152  ;;  %v65_v0 = vlaneseq  ;;  %v155_v10 = vld [vmem:[#allocation5] ss:$0 sm:$0xff]  ;;  %v63_v12 = vld [vmem:[#allocation5 + $0x1] sm:$0xff]  ;;  %s239_s1 = smov [#allocation7]  }
  0x28   :  { %v47_v11 = vld [vmem:[#allocation2] sm:$0xff]  ;;  %45 = vst [vmem:[#allocation7] sm:$0xff] %v155_v10  ;;  %46 = vst [vmem:[#allocation7 + $0x48] sm:$0xff] %v155_v10  ;;  %v48_v14 = vld [vmem:[#allocation2 + $0x8] sm:$0xff]  ;;  %s142_s7 = sshll.u32 %s239_s1, 4  ;;  %s143_s7 = int_to_ptr.vmem [resolvable:$true] %s142_s7 }
  0x29   :  { %v66_v1 = vshrl.u32 %v65_v0, 7  ;;  %v49_v16 = vld [vmem:[#allocation2 + $0x10] sm:$0xff]  ;;  %v50_v18 = vld [vmem:[#allocation2 + $0x18] sm:$0xff]  ;;  %v51_v20 = vld [vmem:[#allocation2 + $0x20] sm:$0xff]  ;;  %s207_s8 = scalar_lea.vmem %s143_s7, 2304  ;;  %p212_p3 = scmp.lt.s32.totalorder %s143_s7, %s143_s7 }
  0x2a   :  { %v52_v22 = vld [vmem:[#allocation2 + $0x28] sm:$0xff]  ;;  %v53_v24 = vld [vmem:[#allocation2 + $0x30] sm:$0xff]  ;;  %v54_v31 = vld [vmem:[#allocation2 + $0x38] sm:$0xff]  ;;  %p208_p2 = scmp.ne.s32.totalorder %s143_s7, %s207_s8  ;;  %p213_p4 = scmp.lt.s32.totalorder %s207_s8, %s207_s8 }
  0x2b   :  { %v67_v2 = vsub.s32 0, %v66_v1  ;;  %v71_v3 = vsub.s32 1, %v66_v1  ;;  %v75_v4 = vsub.s32 2, %v66_v1  ;;  %v79_v5 = vsub.s32 3, %v66_v1  ;;  %v55_v32 = vld [vmem:[#allocation2 + $0x40] sm:$0xff]  ;;  %v56_v33 = vld [vmem:[#allocation2 + $0x48] sm:$0xff] }
  0x2c   :  { %v83_v6 = vsub.s32 4, %v66_v1  ;;  %v87_v7 = vsub.s32 5, %v66_v1  ;;  %v91_v8 = vsub.s32 6, %v66_v1  ;;  %v95_v9 = vsub.s32 7, %v66_v1  ;;  %v57_v38 = vld [vmem:[#allocation2 + $0x50] sm:$0xff]  ;;  %v58_v39 = vld [vmem:[#allocation2 + $0x58] sm:$0xff]  ;;  %p214_p5 = por %p213_p4, %p212_p3 }
  0x2d   :  { %v68_v13 = vrot.slane %v63_v12, %v67_v2  ;;  %v72_v15 = vrot.slane %v63_v12, %v71_v3  ;;  %v76_v17 = vrot.slane %v63_v12, %v75_v4  ;;  %v80_v19 = vrot.slane %v63_v12, %v79_v5  ;;  %v59_v40 = vld [vmem:[#allocation2 + $0x60] sm:$0xff]  ;;  %v60_v45 = vld [vmem:[#allocation2 + $0x68] sm:$0xff]  ;;  %v61_v46 = vld [vmem:[#allocation2 + $0x70] sm:$0xff] }
  0x2e   :  { %v84_v21 = vrot.slane %v63_v12, %v83_v6  ;;  %v88_v23 = vrot.slane %v63_v12, %v87_v7  ;;  %v92_v25 = vrot.slane %v63_v12, %v91_v8  ;;  %v96_v26 = vrot.slane %v63_v12, %v95_v9  ;;  %v62_v47 = vld [vmem:[#allocation2 + $0x78] sm:$0xff]  ;;  %p215_p6 = pnand %p214_p5, %p208_p2 }
  0x2f   :  { %v105_v27 = vadd.f32 %v68_v13, %v47_v11  ;;  %v106_v28 = vadd.f32 %v72_v15, %v48_v14  ;;  %v107_v29 = vadd.f32 %v76_v17, %v49_v16  ;;  %v108_v30 = vadd.f32 %v80_v19, %v50_v18 }
  0x30   :  { %v109_v34 = vadd.f32 %v84_v21, %v51_v20  ;;  %v110_v35 = vadd.f32 %v88_v23, %v52_v22  ;;  %v111_v36 = vadd.f32 %v92_v25, %v53_v24  ;;  %v112_v37 = vadd.f32 %v96_v26, %v54_v31 }
  0x31   :  { %121 = vst [vmem:[#allocation7 + $0x8] sm:$0xff] %v105_v27  ;;  %122 = vst [vmem:[#allocation7 + $0x10] sm:$0xff] %v106_v28  ;;  %v113_v41 = vadd.f32 %v68_v13, %v55_v32  ;;  %v114_v42 = vadd.f32 %v72_v15, %v56_v33  ;;  %v115_v43 = vadd.f32 %v76_v17, %v57_v38 }
  0x32   :  { %123 = vst [vmem:[#allocation7 + $0x18] sm:$0xff] %v107_v29  ;;  %124 = vst [vmem:[#allocation7 + $0x20] sm:$0xff] %v108_v30  ;;  %v116_v44 = vadd.f32 %v80_v19, %v58_v39  ;;  %v117_v48 = vadd.f32 %v84_v21, %v59_v40  ;;  %v118_v49 = vadd.f32 %v88_v23, %v60_v45 }
  0x33   :  { %125 = vst [vmem:[#allocation7 + $0x28] sm:$0xff] %v109_v34  ;;  %126 = vst [vmem:[#allocation7 + $0x30] sm:$0xff] %v110_v35  ;;  %v119_v50 = vadd.f32 %v92_v25, %v61_v46  ;;  %v120_v51 = vadd.f32 %v96_v26, %v62_v47 }
  0x34   :  { %127 = vst [vmem:[#allocation7 + $0x38] sm:$0xff] %v111_v36  ;;  %128 = vst [vmem:[#allocation7 + $0x40] sm:$0xff] %v112_v37 }
  0x35   :  { %129 = vst [vmem:[#allocation7 + $0x50] sm:$0xff] %v113_v41  ;;  %130 = vst [vmem:[#allocation7 + $0x58] sm:$0xff] %v114_v42 }
  0x36   :  { %131 = vst [vmem:[#allocation7 + $0x60] sm:$0xff] %v115_v43  ;;  %132 = vst [vmem:[#allocation7 + $0x68] sm:$0xff] %v116_v44 }
  0x37   :  { %133 = vst [vmem:[#allocation7 + $0x70] sm:$0xff] %v117_v48  ;;  %134 = vst [vmem:[#allocation7 + $0x78] sm:$0xff] %v118_v49 }
  0x38   :  { %135 = vst [vmem:[#allocation7 + $0x80] sm:$0xff] %v119_v50  ;;  %136 = vst [vmem:[#allocation7 + $0x88] sm:$0xff] %v120_v51 }
  0x39   :  { %218 = shalt.err (!%p215_p6)
}
  0x3a   :  { %s219_s11 = scalar_lea.hbm %s295_s2, 2304 }
  0x3b   :  { %p220_p7 = scmp.ne.s32.totalorder %s295_s2, %s219_s11  ;;  %p223_p8 = scmp.lt.u32.totalorder %s219_s11, %s295_s2 }
  0x3d   :  { %p225_p9 = pnand %p223_p8, %p220_p7 }
  0x3f   :  { %228 = shalt.err (!%p225_p9)
}
  0x40   :  { %s240_s16 = smov 1152   ;;  %s241_s17 = smov 72  }
  0x41   :  { %148 = dma.vmem_to_hbm [thread:$0]  %s143_s7, 2304, %s295_s2, [#allocation4], %s240_s16, %s240_s16, %s241_s17  }
  0x42   :  { %233 = dma.done.wait [#allocation4], 2304  }
  0x43   :  { %234 = vsyncadd [#allocation4], 4294964992 }
  0x44   :  { %152 = vsyncpa [#allocation3], 1 }
  0x45   :  { %153 = vsyncpa [#allocation6], 1 }
  0x46   :  { %154 = vsyncpa [#allocation4], 1 }

</bundles_post_ra>
